<compile_context>
chip_gen: v6e
topology: v6e:2x2x1
jax: 0.10.0
libtpu: 0.0.40
codegen_flags: <defaults>
</compile_context>

<pallas_src>
import functools

import jax
import jax.numpy as jnp
from jax.experimental import pallas as pl
from jax.experimental.pallas import tpu as pltpu


def _decoder_step_kernel(
    ids_ref,      # (B, 1)   int32 token ids
    h_ref,        # (B, H)   f32 previous hidden state (layer 0)
    c_ref,        # (B, H)   f32 previous cell state   (layer 0)
    emb_ref,      # (O, H)   bf16 embedding table
    w_cat_ref,    # (2H, 4H) bf16 stacked [W_ih^T ; W_hh^T]
    b_ref,        # (1, 4H)  f32 combined bias (b_ih + b_hh)
    w_fc_ref,     # (H, O)   bf16 fc weight, transposed
    b_fc_ref,     # (1, O)   f32 fc bias
    pred_ref,     # (B, O)   f32 output: prediction logits
    h_out_ref,    # (B, H)   f32 output: new hidden state (aliases h_ref buffer)
    c_out_ref,    # (B, H)   f32 output: new cell state   (aliases c_ref buffer)
):
    B, H = h_ref.shape
    O = emb_ref.shape[0]
    w_dtype = emb_ref.dtype

    # ---- fused embedding gather: one-hot(ids) @ table  (MXU, exact for one-hot) ----
    ids = ids_ref[...]                                             # (B, 1) int32
    onehot = jnp.where(
        ids == jax.lax.broadcasted_iota(jnp.int32, (B, O), 1), 1.0, 0.0
    ).astype(w_dtype)                                              # (B, O)
    emb = jnp.dot(onehot, emb_ref[...],
                  preferred_element_type=jnp.float32)              # (B, H) f32

    h = h_ref[...]                                                 # (B, H) f32
    c = c_ref[...]                                                 # (B, H) f32

    # ---- fused gate matmul: [emb | h] (B, 2H) @ W_cat (2H, 4H) ----
    xh = jnp.concatenate([emb, h], axis=1).astype(w_dtype)         # (B, 2H) bf16
    gates = jnp.dot(xh, w_cat_ref[...],
                    preferred_element_type=jnp.float32) + b_ref[...]   # (B, 4H) f32

    # PyTorch gate order: input, forget, cell(g), output.  Static 128-lane-aligned slices.
    i_g = jax.nn.sigmoid(gates[:, 0 * H:1 * H])
    f_g = jax.nn.sigmoid(gates[:, 1 * H:2 * H])
    g_g = jnp.tanh(gates[:, 2 * H:3 * H])
    o_g = jax.nn.sigmoid(gates[:, 3 * H:4 * H])

    c_new = f_g * c + i_g * g_g
    h_new = o_g * jnp.tanh(c_new)

    # ---- output projection ----
    pred = jnp.dot(h_new.astype(w_dtype), w_fc_ref[...],
                   preferred_element_type=jnp.float32) + b_fc_ref[...]

    pred_ref[...] = pred
    h_out_ref[...] = h_new
    c_out_ref[...] = c_new


def prepare_params(params, weight_dtype=jnp.bfloat16):
    """One-time weight preparation (transpose / stack / bias combine / bf16 cast).

    Do this ONCE, outside the per-token forward path.
    """
    H = params["embedding"].shape[1]
    O = params["w_fc"].shape[0]
    w_cat = jnp.concatenate([params["w_ih"].T, params["w_hh"].T], axis=0)   # (2H, 4H)
    return {
        "emb_table": params["embedding"].astype(weight_dtype),              # (O, H)
        "w_cat": w_cat.astype(weight_dtype),                                # (2H, 4H)
        "b_gates": (params["b_ih"] + params["b_hh"]).reshape(1, 4 * H).astype(jnp.float32),
        "w_fc_t": params["w_fc"].T.astype(weight_dtype),                    # (H, O)
        "b_fc": params["b_fc"].reshape(1, O).astype(jnp.float32),           # (1, O)
    }


@functools.partial(jax.jit, static_argnames=())
def decoder_forward(x, hidden, cell, prepared):
    """Mirrors Decoder.forward(x, hidden, cell).

    x:      (B,)  int token ids
    hidden: (num_layers=1, B, H) f32
    cell:   (num_layers=1, B, H) f32
    returns (prediction (B, O) f32, hidden (1, B, H) f32, cell (1, B, H) f32)
    """
    B = x.shape[0]
    H = hidden.shape[-1]
    O = prepared["w_fc_t"].shape[1]

    ids = x.astype(jnp.int32).reshape(B, 1)
    h0 = hidden[0]
    c0 = cell[0]

    vmem = pl.BlockSpec(memory_space=pltpu.VMEM)

    pred, h_new, c_new = pl.pallas_call(
        _decoder_step_kernel,
        out_shape=(
            jax.ShapeDtypeStruct((B, O), jnp.float32),
            jax.ShapeDtypeStruct((B, H), jnp.float32),
            jax.ShapeDtypeStruct((B, H), jnp.float32),
        ),
        # No grid: all operands fit comfortably in VMEM at these shapes; full-array blocks.
        in_specs=[vmem] * 8,
        out_specs=(vmem, vmem, vmem),
        # Recurrent state updated in place: h0 -> h_out, c0 -> c_out.
        input_output_aliases={1: 1, 2: 2},
    )(ids, h0, c0,
      prepared["emb_table"], prepared["w_cat"], prepared["b_gates"],
      prepared["w_fc_t"], prepared["b_fc"])

    # num_layers = 1: re-add the layer axis on the returned states.
    return pred, h_new[None, :, :], c_new[None, :, :]


def init_params(key, output_size, hidden_size):
    ks = jax.random.split(key, 7)
    scale = 0.1
    return {
        "embedding": scale * jax.random.normal(ks[0], (output_size, hidden_size), jnp.float32),
        "w_ih": scale * jax.random.normal(ks[1], (4 * hidden_size, hidden_size), jnp.float32),
        "w_hh": scale * jax.random.normal(ks[2], (4 * hidden_size, hidden_size), jnp.float32),
        "b_ih": scale * jax.random.normal(ks[3], (4 * hidden_size,), jnp.float32),
        "b_hh": scale * jax.random.normal(ks[4], (4 * hidden_size,), jnp.float32),
        "w_fc": scale * jax.random.normal(ks[5], (output_size, hidden_size), jnp.float32),
        "b_fc": scale * jax.random.normal(ks[6], (output_size,), jnp.float32),
    }


if __name__ == "__main__":
    # Small shapes consistent with the module: batch=8, hidden=128, vocab(output)=128.
    B, H, O = 8, 128, 128
    key = jax.random.PRNGKey(0)
    k_par, k_x, k_h, k_c = jax.random.split(key, 4)

    params = init_params(k_par, output_size=O, hidden_size=H)
    prepared = prepare_params(params)      # one-time weight prep (hoisted out of forward)

    x = jax.random.randint(k_x, (B,), 0, O, dtype=jnp.int32)       # token ids
    hidden = jax.random.normal(k_h, (1, B, H), jnp.float32)        # (num_layers, B, H)
    cell = jax.random.normal(k_c, (1, B, H), jnp.float32)

    pred, h_new, c_new = decoder_forward(x, hidden, cell, prepared)
    jax.block_until_ready((pred, h_new, c_new))

    def lstm_step(emb, h0, c0, gates_fn, w_out_fn):
        gates = gates_fn(emb, h0)
        i_g = jax.nn.sigmoid(gates[:, 0 * H:1 * H])
        f_g = jax.nn.sigmoid(gates[:, 1 * H:2 * H])
        g_g = jnp.tanh(gates[:, 2 * H:3 * H])
        o_g = jax.nn.sigmoid(gates[:, 3 * H:4 * H])
        c_r = f_g * c0 + i_g * g_g
        h_r = o_g * jnp.tanh(c_r)
        return w_out_fn(h_r), h_r, c_r

    # --- Tight reference: same bf16 quantization points as the kernel (checks the kernel). ---
    emb_q = jnp.take(prepared["emb_table"], x, axis=0).astype(jnp.float32)
    def gates_q(emb, h0):
        xh = jnp.concatenate([emb, h0], axis=1).astype(jnp.bfloat16)
        return jnp.dot(xh, prepared["w_cat"], preferred_element_type=jnp.float32) + prepared["b_gates"]
    def out_q(h_r):
        return jnp.dot(h_r.astype(jnp.bfloat16), prepared["w_fc_t"],
                       preferred_element_type=jnp.float32) + prepared["b_fc"]
    pred_q, h_q, c_q = lstm_step(emb_q, hidden[0], cell[0], gates_q, out_q)

    assert jnp.allclose(pred, pred_q, atol=1e-3, rtol=1e-3)
    assert jnp.allclose(h_new[0], h_q, atol=1e-3, rtol=1e-3)
    assert jnp.allclose(c_new[0], c_q, atol=1e-3, rtol=1e-3)

    # --- Loose reference: full-f32 weights (checks module semantics despite bf16 weights). ---
    emb_f = jnp.take(params["embedding"], x, axis=0)
    def gates_f(emb, h0):
        return (emb @ params["w_ih"].T + h0 @ params["w_hh"].T
                + params["b_ih"] + params["b_hh"])
    def out_f(h_r):
        return h_r @ params["w_fc"].T + params["b_fc"]
    pred_f, h_f, c_f = lstm_step(emb_f, hidden[0], cell[0], gates_f, out_f)

    assert jnp.allclose(pred, pred_f, atol=5e-2, rtol=5e-2)
    assert jnp.allclose(h_new[0], h_f, atol=5e-2, rtol=5e-2)
    assert jnp.allclose(c_new[0], c_f, atol=5e-2, rtol=5e-2)

    assert pred.shape == (B, O) and h_new.shape == (1, B, H) and c_new.shape == (1, B, H)

    print("KERNEL_OK")
</pallas_src>

<mosaic_0001>
module attributes {stable_mosaic.version = 11 : i64} {
  func.func @_decoder_step_kernel(%arg0: memref<8x1xi32, #tpu.memory_space<vmem>>, %arg1: memref<8x128xf32, #tpu.memory_space<vmem>>, %arg2: memref<8x128xf32, #tpu.memory_space<vmem>>, %arg3: memref<128x128xbf16, #tpu.memory_space<vmem>>, %arg4: memref<256x512xbf16, #tpu.memory_space<vmem>>, %arg5: memref<1x512xf32, #tpu.memory_space<vmem>>, %arg6: memref<128x128xbf16, #tpu.memory_space<vmem>>, %arg7: memref<1x128xf32, #tpu.memory_space<vmem>>, %arg8: memref<8x128xf32, #tpu.memory_space<vmem>>, %arg9: memref<8x128xf32, #tpu.memory_space<vmem>>, %arg10: memref<8x128xf32, #tpu.memory_space<vmem>>) attributes {dimension_semantics = [], scalar_prefetch = 0 : i64, scratch_operands = 0 : i64, tpu.core_type = #tpu.core_type<tc>} {
    %c0 = arith.constant 0 : index
    %c0_0 = arith.constant 0 : index
    %0 = vector.load %arg0[%c0, %c0_0] : memref<8x1xi32, #tpu.memory_space<vmem>>, vector<8x1xi32>
    %1 = tpu.iota {dimensions = array<i32: 1>} : vector<8x128xi32>
    %2 = vector.broadcast %0 : vector<8x1xi32> to vector<8x128xi32>
    %3 = arith.cmpi eq, %2, %1 : vector<8x128xi32>
    %cst = arith.constant 1.000000e+00 : f32
    %cst_1 = arith.constant 0.000000e+00 : f32
    %4 = vector.broadcast %cst : f32 to vector<8x128xf32>
    %5 = vector.broadcast %cst_1 : f32 to vector<8x128xf32>
    %6 = arith.select %3, %4, %5 : vector<8x128xi1>, vector<8x128xf32>
    %7 = arith.truncf %6 : vector<8x128xf32> to vector<8x128xbf16>
    %c0_2 = arith.constant 0 : index
    %c0_3 = arith.constant 0 : index
    %8 = vector.load %arg3[%c0_2, %c0_3] : memref<128x128xbf16, #tpu.memory_space<vmem>>, vector<128x128xbf16>
    %cst_4 = arith.constant dense<0.000000e+00> : vector<8x128xf32>
    %9 = tpu.matmul %7, %8, %cst_4 {dimension_numbers = #tpu.dot_dimension_numbers<[1], [0], [0], [1], [0, 0, 1, 1], [], []>} : vector<8x128xbf16>, vector<128x128xbf16>, vector<8x128xf32> -> vector<8x128xf32>
    %c0_5 = arith.constant 0 : index
    %c0_6 = arith.constant 0 : index
    %10 = vector.load %arg1[%c0_5, %c0_6] : memref<8x128xf32, #tpu.memory_space<vmem>>, vector<8x128xf32>
    %c0_7 = arith.constant 0 : index
    %c0_8 = arith.constant 0 : index
    %11 = vector.load %arg2[%c0_7, %c0_8] : memref<8x128xf32, #tpu.memory_space<vmem>>, vector<8x128xf32>
    %12 = tpu.concatenate %9, %10 in 1 : vector<8x128xf32>, vector<8x128xf32> -> vector<8x256xf32>
    %13 = arith.truncf %12 : vector<8x256xf32> to vector<8x256xbf16>
    %c0_9 = arith.constant 0 : index
    %c0_10 = arith.constant 0 : index
    %14 = vector.load %arg4[%c0_9, %c0_10] : memref<256x512xbf16, #tpu.memory_space<vmem>>, vector<256x512xbf16>
    %cst_11 = arith.constant dense<0.000000e+00> : vector<8x512xf32>
    %15 = tpu.matmul %13, %14, %cst_11 {dimension_numbers = #tpu.dot_dimension_numbers<[1], [0], [0], [1], [0, 0, 1, 1], [], []>} : vector<8x256xbf16>, vector<256x512xbf16>, vector<8x512xf32> -> vector<8x512xf32>
    %c0_12 = arith.constant 0 : index
    %c0_13 = arith.constant 0 : index
    %16 = vector.load %arg5[%c0_12, %c0_13] : memref<1x512xf32, #tpu.memory_space<vmem>>, vector<1x512xf32>
    %17 = vector.broadcast %16 : vector<1x512xf32> to vector<8x512xf32>
    %18 = arith.addf %15, %17 : vector<8x512xf32>
    %19 = vector.extract_strided_slice %18 {offsets = [0, 0], sizes = [8, 128], strides = [1, 1]} : vector<8x512xf32> to vector<8x128xf32>
    %20 = arith.negf %19 : vector<8x128xf32>
    %21 = math.exp %20 : vector<8x128xf32>
    %cst_14 = arith.constant 1.000000e+00 : f32
    %22 = vector.broadcast %cst_14 : f32 to vector<8x128xf32>
    %23 = arith.addf %22, %21 : vector<8x128xf32>
    %24 = arith.divf %22, %23 : vector<8x128xf32>
    %25 = vector.extract_strided_slice %18 {offsets = [0, 128], sizes = [8, 128], strides = [1, 1]} : vector<8x512xf32> to vector<8x128xf32>
    %26 = arith.negf %25 : vector<8x128xf32>
    %27 = math.exp %26 : vector<8x128xf32>
    %cst_15 = arith.constant 1.000000e+00 : f32
    %28 = vector.broadcast %cst_15 : f32 to vector<8x128xf32>
    %29 = arith.addf %28, %27 : vector<8x128xf32>
    %30 = arith.divf %28, %29 : vector<8x128xf32>
    %31 = vector.extract_strided_slice %18 {offsets = [0, 256], sizes = [8, 128], strides = [1, 1]} : vector<8x512xf32> to vector<8x128xf32>
    %32 = math.tanh %31 : vector<8x128xf32>
    %33 = vector.extract_strided_slice %18 {offsets = [0, 384], sizes = [8, 128], strides = [1, 1]} : vector<8x512xf32> to vector<8x128xf32>
    %34 = arith.negf %33 : vector<8x128xf32>
    %35 = math.exp %34 : vector<8x128xf32>
    %cst_16 = arith.constant 1.000000e+00 : f32
    %36 = vector.broadcast %cst_16 : f32 to vector<8x128xf32>
    %37 = arith.addf %36, %35 : vector<8x128xf32>
    %38 = arith.divf %36, %37 : vector<8x128xf32>
    %39 = arith.mulf %30, %11 : vector<8x128xf32>
    %40 = arith.mulf %24, %32 : vector<8x128xf32>
    %41 = arith.addf %39, %40 : vector<8x128xf32>
    %42 = math.tanh %41 : vector<8x128xf32>
    %43 = arith.mulf %38, %42 : vector<8x128xf32>
    %44 = arith.truncf %43 : vector<8x128xf32> to vector<8x128xbf16>
    %c0_17 = arith.constant 0 : index
    %c0_18 = arith.constant 0 : index
    %45 = vector.load %arg6[%c0_17, %c0_18] : memref<128x128xbf16, #tpu.memory_space<vmem>>, vector<128x128xbf16>
    %cst_19 = arith.constant dense<0.000000e+00> : vector<8x128xf32>
    %46 = tpu.matmul %44, %45, %cst_19 {dimension_numbers = #tpu.dot_dimension_numbers<[1], [0], [0], [1], [0, 0, 1, 1], [], []>} : vector<8x128xbf16>, vector<128x128xbf16>, vector<8x128xf32> -> vector<8x128xf32>
    %c0_20 = arith.constant 0 : index
    %c0_21 = arith.constant 0 : index
    %47 = vector.load %arg7[%c0_20, %c0_21] : memref<1x128xf32, #tpu.memory_space<vmem>>, vector<1x128xf32>
    %48 = vector.broadcast %47 : vector<1x128xf32> to vector<8x128xf32>
    %49 = arith.addf %46, %48 : vector<8x128xf32>
    %c0_22 = arith.constant 0 : index
    %c0_23 = arith.constant 0 : index
    %50 = vector.load %arg8[%c0_22, %c0_23] : memref<8x128xf32, #tpu.memory_space<vmem>>, vector<8x128xf32>
    tpu.vector_store %arg8[%c0_22, %c0_23], %49 {strides = array<i32>} : memref<8x128xf32, #tpu.memory_space<vmem>>, vector<8x128xf32>,
    %c0_24 = arith.constant 0 : index
    %c0_25 = arith.constant 0 : index
    %51 = vector.load %arg9[%c0_24, %c0_25] : memref<8x128xf32, #tpu.memory_space<vmem>>, vector<8x128xf32>
    tpu.vector_store %arg9[%c0_24, %c0_25], %43 {strides = array<i32>} : memref<8x128xf32, #tpu.memory_space<vmem>>, vector<8x128xf32>,
    %c0_26 = arith.constant 0 : index
    %c0_27 = arith.constant 0 : index
    %52 = vector.load %arg10[%c0_26, %c0_27] : memref<8x128xf32, #tpu.memory_space<vmem>>, vector<8x128xf32>
    tpu.vector_store %arg10[%c0_26, %c0_27], %41 {strides = array<i32>} : memref<8x128xf32, #tpu.memory_space<vmem>>, vector<8x128xf32>,
    return
  }
}

</mosaic_0001>

<bundles_post_ra>
// kernel: decoder_forward.1
= control target key start
LH: loop header
LB: loop body
LE: loop exit
PB: predicated region body
PF: predicated region fallthrough
CT: control target
= control target key end

     0   :  { %16 = vsyncpa [#allocation3], 0  ;;  %s1336_s0 = inlined_call_operand.vmem [shape: s32[8,1], index: 0, kind: input, shape index: {}]   ;;  %s1337_s1 = inlined_call_operand.vmem [shape: f32[8,128], index: 1, kind: input, shape index: {}, may-alias: {1,9}]   ;;  %s1338_s2 = inlined_call_operand.vmem [shape: f32[8,128], index: 2, kind: input, shape index: {}, may-alias: {2,10}]   ;;  %s1339_s3 = inlined_call_operand.hbm [shape: bf16[128,128], index: 3, kind: input, shape index: {}]   ;;  %s1340_s4 = inlined_call_operand.hbm [shape: bf16[256,512], index: 4, kind: input, shape index: {}]   ;;  %s1341_s5 = inlined_call_operand.vmem [shape: f32[1,512], index: 5, kind: input, shape index: {}]   ;;  %s1342_s6 = inlined_call_operand.hbm [shape: bf16[128,128], index: 6, kind: input, shape index: {}]   ;;  %s1343_s7 = inlined_call_operand.vmem [shape: f32[1,128], index: 7, kind: input, shape index: {}]   ;;  %s1344_s8 = inlined_call_operand.hbm [shape: f32[8,128], index: 8, kind: output, shape index: {0}]   ;;  %s1345_s9 = inlined_call_operand.vmem [shape: f32[8,128], index: 9, kind: output, shape index: {1}, may-alias: {1,9}]   ;;  %s1346_s10 = inlined_call_operand.vmem [shape: f32[8,128], index: 10, kind: output, shape index: {2}, may-alias: {2,10}]  }
   0x1   :  { %17 = vsyncpa [#allocation6], 0 }
   0x2   :  { %18 = vsyncpa [#allocation4], 0  ;;  %s1214_s13 = smov [#allocation5]  }
   0x3   :  { %s42_s14 = sshll.u32 %s1214_s13, 4  ;;  %s43_s14 = int_to_ptr.vmem [resolvable:$true] %s42_s14 }
   0x4   :  { %s1136_s15 = scalar_lea.vmem %s43_s14, 8192  ;;  %p1141_p1 = scmp.lt.s32.totalorder %s43_s14, %s43_s14 }
   0x5   :  { %p1137_p0 = scmp.ne.s32.totalorder %s43_s14, %s1136_s15  ;;  %p1142_p2 = scmp.lt.s32.totalorder %s1136_s15, %s1136_s15 }
   0x7   :  { %p1143_p3 = por %p1142_p2, %p1141_p1 }
   0x9   :  { %p1144_p4 = pnand %p1143_p3, %p1137_p0 }
   0xb   :  { %1147 = shalt.err (!%p1144_p4)
}
   0xc   :  { %s1215_s16 = smov 256   ;;  %s1216_s17 = smov 16  }
   0xd   :  { %48 = dma.hbm_to_vmem [thread:$0]  %s1340_s4, 8192, %s43_s14, [#allocation6], %s1215_s16, %s1215_s16, %s1216_s17  }
   0xe   :  { %s1217_s20 = smov [#allocation2]  }
   0xf   :  { %s30_s21 = sshll.u32 %s1217_s20, 4  ;;  %s31_s21 = int_to_ptr.vmem [resolvable:$true] %s30_s21 }
  0x10   :  { %s1156_s22 = scalar_lea.vmem %s31_s21, 1024  ;;  %p1161_p6 = scmp.lt.s32.totalorder %s31_s21, %s31_s21 }
  0x11   :  { %p1157_p5 = scmp.ne.s32.totalorder %s31_s21, %s1156_s22  ;;  %p1162_p7 = scmp.lt.s32.totalorder %s1156_s22, %s1156_s22 }
  0x13   :  { %p1163_p8 = por %p1162_p7, %p1161_p6 }
  0x15   :  { %p1164_p9 = pnand %p1163_p8, %p1157_p5 }
  0x17   :  { %1167 = shalt.err (!%p1164_p9)
}
  0x18   :  { %s1218_s23 = smov 64   ;;  %s1219_s24 = smov 4  }
  0x19   :  { %36 = dma.hbm_to_vmem [thread:$0]  %s1339_s3, 1024, %s31_s21, [#allocation3], %s1218_s23, %s1218_s23, %s1219_s24  }
  0x1a   :  { %s1220_s27 = smov [#allocation7]  }
  0x1b   :  { %s56_s28 = sshll.u32 %s1220_s27, 4  ;;  %s57_s28 = int_to_ptr.vmem [resolvable:$true] %s56_s28 }
  0x1c   :  { %s1176_s4 = scalar_lea.vmem %s57_s28, 1024  ;;  %p1181_p11 = scmp.lt.s32.totalorder %s57_s28, %s57_s28 }
  0x1d   :  { %p1177_p10 = scmp.ne.s32.totalorder %s57_s28, %s1176_s4  ;;  %p1182_p12 = scmp.lt.s32.totalorder %s1176_s4, %s1176_s4 }
  0x1f   :  { %p1183_p13 = por %p1182_p12, %p1181_p11 }
  0x21   :  { %p1184_p0 = pnand %p1183_p13, %p1177_p10 }
  0x23   :  { %1187 = shalt.err (!%p1184_p0)
}
  0x24   :  { %62 = dma.hbm_to_vmem [thread:$0]  %s1342_s6, 1024, %s57_s28, [#allocation6], %s1218_s23, %s1218_s23, %s1219_s24  }
  0x25   :  { %1208 = dma.done.wait [#allocation3], 1024  }
  0x26   :  { %1209 = vsyncadd [#allocation3], 4294966272 }
  0x27   :  { %1210 = dma.done.wait [#allocation6], 9216  }
  0x28   :  { %1211 = vsyncadd [#allocation6], 4294958080  ;;  %v1221_v0 = vmov 0   ;;  %v1222_v1 = vmov 0.0   ;;  %vm1223_vm0 = vmmov 0   ;;  %v75_v2 = vld [vmem:[%s1336_s0] sm:$0xff]  ;;  %v76_v43 = vlaneseq }
  0x29   :  { %999 = vset.pattern.permute.xlu0 %v1221_v0  ;;  %947 = vmatprep.subr.bf16.mxu0 %v1222_v1  ;;  %v1000_v3 = vld [vmem:[#allocation2 + $0x38] sm:$0xff]   ;;  %v1001_v4 = vld [vmem:[#allocation2 + $0x30] sm:$0xff]   ;;  %v1002_v5 = vld [vmem:[#allocation2 + $0x28] sm:$0xff]   ;;  %v1224_v48 = vmov 1.0|1.0   ;;  %s1225_s19 = smov [#allocation8]  }
  0x2a   :  { %963 = vmatprep.mubr.msk.bf16.mxu0 %vm1223_vm0, %v1222_v1  ;;  %79 = vperm.xlu0 %999, %v75_v2   ;;  %v1008_v6 = vld [vmem:[#allocation5 + $0xe4] ss:$16 sps:$4 sm:$0xff]   ;;  %v1013_v8 = vld [vmem:[#allocation5 + $0xe0] ss:$16 sps:$4 sm:$0xff]   ;;  %v1004_v12 = vld [vmem:[#allocation2 + $0x18] sm:$0xff]   ;;  %v77_v44 = vand.u32 127, %v76_v43 }
  0x2b   :  { %948 = vmatpush3.bf16.msra.mxu0 %v1000_v3  ;;  %v1003_v7 = vld [vmem:[#allocation2 + $0x20] sm:$0xff]   ;;  %598 = vmatprep.subr.bf16.mxu1 %v1008_v6  ;;  %v1005_v15 = vld [vmem:[#allocation2 + $0x10] sm:$0xff]   ;;  %v1006_v18 = vld [vmem:[#allocation2 + $0x8] sm:$0xff]   ;;  %s825_s20 = sshll.u32 %s1225_s19, 4  ;;  %s826_s20 = int_to_ptr.vmem [resolvable:$true] %s825_s20 }
  0x2c   :  { %949 = vmatprep.subr.bf16.mxu0 %v1222_v1  ;;  %v1014_v9 = vld [vmem:[#allocation5 + $0xc4] ss:$16 sps:$4 sm:$0xff]   ;;  %599 = vmatpush1.bf16.msra.mxu1 %v1013_v8  ;;  %v1019_v10 = vld [vmem:[#allocation5 + $0xc0] ss:$16 sps:$4 sm:$0xff]   ;;  %v1012_v22 = vld [vmem:[#allocation5 + $0xec] ss:$16 sps:$4 sm:$0xff]   ;;  %p1193_p2 = scmp.lt.s32.totalorder %s826_s20, %s826_s20 }
  0x2d   :  { %600 = vmatprep.subr.bf16.mxu1 %v1014_v9  ;;  %v1020_v11 = vld [vmem:[#allocation5 + $0xa4] ss:$16 sps:$4 sm:$0xff]   ;;  %v1025_v13 = vld [vmem:[#allocation5 + $0xa0] ss:$16 sps:$4 sm:$0xff]   ;;  %v1010_v46 = vld [vmem:[#allocation5 + $0xe8] ss:$16 sps:$4 sm:$0xff]  }
  0x2e   :  { %v1026_v14 = vld [vmem:[#allocation5 + $0x84] ss:$16 sps:$4 sm:$0xff]   ;;  %v1031_v16 = vld [vmem:[#allocation5 + $0x80] ss:$16 sps:$4 sm:$0xff]   ;;  %v1018_v47 = vld [vmem:[#allocation5 + $0xcc] ss:$16 sps:$4 sm:$0xff]  }
  0x2f   :  { %950 = vmatpush3.bf16.msra.mxu0 %v1001_v4  ;;  %v1032_v17 = vld [vmem:[#allocation5 + $0x64] ss:$16 sps:$4 sm:$0xff]   ;;  %v1037_v19 = vld [vmem:[#allocation5 + $0x60] ss:$16 sps:$4 sm:$0xff]   ;;  %v1016_v49 = vld [vmem:[#allocation5 + $0xc8] ss:$16 sps:$4 sm:$0xff]  }
  0x30   :  { %951 = vmatprep.subr.bf16.mxu0 %v1222_v1  ;;  %601 = vmatpush1.bf16.msra.mxu1 %v1019_v10  ;;  %v1038_v20 = vld [vmem:[#allocation5 + $0x44] ss:$16 sps:$4 sm:$0xff]   ;;  %v1043_v23 = vld [vmem:[#allocation5 + $0x40] ss:$16 sps:$4 sm:$0xff]   ;;  %v1024_v50 = vld [vmem:[#allocation5 + $0xac] ss:$16 sps:$4 sm:$0xff]  }
  0x31   :  { %602 = vmatprep.subr.bf16.mxu1 %v1020_v11  ;;  %v1007_v21 = vld [vmem:[#allocation2] sm:$0xff]   ;;  %v1022_v51 = vld [vmem:[#allocation5 + $0xa8] ss:$16 sps:$4 sm:$0xff]   ;;  %v1030_v52 = vld [vmem:[#allocation5 + $0x8c] ss:$16 sps:$4 sm:$0xff]  }
  0x32   :  { %v1044_v24 = vld [vmem:[#allocation5 + $0x24] ss:$16 sps:$4 sm:$0xff]   ;;  %v1049_v25 = vld [vmem:[#allocation5 + $0x20] ss:$16 sps:$4 sm:$0xff]   ;;  %v1028_v53 = vld [vmem:[#allocation5 + $0x88] ss:$16 sps:$4 sm:$0xff]  }
  0x33   :  { %952 = vmatpush3.bf16.msra.mxu0 %v1002_v5  ;;  %v1050_v26 = vld [vmem:[#allocation5 + $0x4] ss:$16 sps:$4 sm:$0xff]   ;;  %v1055_v27 = vld [vmem:[#allocation5] ss:$16 sps:$4 sm:$0xff]   ;;  %v1036_v54 = vld [vmem:[#allocation5 + $0x6c] ss:$16 sps:$4 sm:$0xff]  }
  0x34   :  { %953 = vmatprep.subr.bf16.mxu0 %v1222_v1  ;;  %603 = vmatpush1.bf16.msra.mxu1 %v1025_v13  ;;  %v1056_v28 = vld [vmem:[#allocation5 + $0x1e4] ss:$16 sps:$4 sm:$0xff]   ;;  %v1061_v29 = vld [vmem:[#allocation5 + $0x1e0] ss:$16 sps:$4 sm:$0xff]   ;;  %v1034_v55 = vld [vmem:[#allocation5 + $0x68] ss:$16 sps:$4 sm:$0xff]  }
  0x35   :  { %604 = vmatprep.subr.bf16.mxu1 %v1026_v14  ;;  %v1062_v30 = vld [vmem:[#allocation5 + $0x1c4] ss:$16 sps:$4 sm:$0xff]   ;;  %v1067_v31 = vld [vmem:[#allocation5 + $0x1c0] ss:$16 sps:$4 sm:$0xff]   ;;  %v1042_v56 = vld [vmem:[#allocation5 + $0x4c] ss:$16 sps:$4 sm:$0xff]  }
  0x36   :  { %v1068_v32 = vld [vmem:[#allocation5 + $0x1a4] ss:$16 sps:$4 sm:$0xff]   ;;  %v1073_v33 = vld [vmem:[#allocation5 + $0x1a0] ss:$16 sps:$4 sm:$0xff]   ;;  %v1040_v57 = vld [vmem:[#allocation5 + $0x48] ss:$16 sps:$4 sm:$0xff]  }
  0x37   :  { %954 = vmatpush3.bf16.msra.mxu0 %v1003_v7  ;;  %v1074_v34 = vld [vmem:[#allocation5 + $0x184] ss:$16 sps:$4 sm:$0xff]   ;;  %v1079_v35 = vld [vmem:[#allocation5 + $0x180] ss:$16 sps:$4 sm:$0xff]   ;;  %v1048_v58 = vld [vmem:[#allocation5 + $0x2c] ss:$16 sps:$4 sm:$0xff]  }
  0x38   :  { %955 = vmatprep.subr.bf16.mxu0 %v1222_v1  ;;  %605 = vmatpush1.bf16.msra.mxu1 %v1031_v16  ;;  %v1080_v36 = vld [vmem:[#allocation5 + $0x164] ss:$16 sps:$4 sm:$0xff]   ;;  %v1085_v37 = vld [vmem:[#allocation5 + $0x160] ss:$16 sps:$4 sm:$0xff]   ;;  %v1046_v59 = vld [vmem:[#allocation5 + $0x28] ss:$16 sps:$4 sm:$0xff]  }
  0x39   :  { %606 = vmatprep.subr.bf16.mxu1 %v1032_v17  ;;  %v1086_v38 = vld [vmem:[#allocation5 + $0x144] ss:$16 sps:$4 sm:$0xff]   ;;  %v1091_v39 = vld [vmem:[#allocation5 + $0x140] ss:$16 sps:$4 sm:$0xff]   ;;  %v1054_v60 = vld [vmem:[#allocation5 + $0xc] ss:$16 sps:$4 sm:$0xff]  }
  0x3a   :  { %v1092_v40 = vld [vmem:[#allocation5 + $0x124] ss:$16 sps:$4 sm:$0xff]   ;;  %v1097_v41 = vld [vmem:[#allocation5 + $0x120] ss:$16 sps:$4 sm:$0xff]   ;;  %v1052_v61 = vld [vmem:[#allocation5 + $0x8] ss:$16 sps:$4 sm:$0xff]  }
  0x3b   :  { %956 = vmatpush3.bf16.msra.mxu0 %v1004_v12  ;;  %v1098_v42 = vld [vmem:[#allocation5 + $0x104] ss:$16 sps:$4 sm:$0xff]   ;;  %v1060_v62 = vld [vmem:[#allocation5 + $0x1ec] ss:$16 sps:$4 sm:$0xff]   ;;  %v1058_v63 = vld [vmem:[#allocation5 + $0x1e8] ss:$16 sps:$4 sm:$0xff]  }
  0x3c   :  { %957 = vmatprep.subr.bf16.mxu0 %v1222_v1  ;;  %607 = vmatpush1.bf16.msra.mxu1 %v1037_v19  ;;  %v1066_v0 = vld [vmem:[#allocation5 + $0x1cc] ss:$16 sps:$4 sm:$0xff]   ;;  %v1064_v2 = vld [vmem:[#allocation5 + $0x1c8] ss:$16 sps:$4 sm:$0xff]   ;;  %v188_v16 = vld [vmem:[%s1337_s1] sm:$0xff] }
  0x3d   :  { %608 = vmatprep.subr.bf16.mxu1 %v1038_v20  ;;  %v1072_v3 = vld [vmem:[#allocation5 + $0x1ac] ss:$16 sps:$4 sm:$0xff]   ;;  %v1070_v4 = vld [vmem:[#allocation5 + $0x1a8] ss:$16 sps:$4 sm:$0xff]   ;;  %v191_v17 = vpack.c.bf16 %v188_v16, %v188_v16 }
  0x3e   :  { %v1078_v5 = vld [vmem:[#allocation5 + $0x18c] ss:$16 sps:$4 sm:$0xff]   ;;  %v1076_v6 = vld [vmem:[#allocation5 + $0x188] ss:$16 sps:$4 sm:$0xff]  }
  0x3f   :  { %958 = vmatpush3.bf16.msra.mxu0 %v1005_v15  ;;  %v1084_v7 = vld [vmem:[#allocation5 + $0x16c] ss:$16 sps:$4 sm:$0xff]   ;;  %v1082_v8 = vld [vmem:[#allocation5 + $0x168] ss:$16 sps:$4 sm:$0xff]   ;;  %v1103_v15 = vld [vmem:[#allocation5 + $0x100] ss:$16 sps:$4 sm:$0xff]   ;;  %630 = vmatprep.mubr.bf16.mxu1 %v191_v17 }
  0x40   :  { %959 = vmatprep.subr.bf16.mxu0 %v1222_v1  ;;  %609 = vmatpush1.bf16.msra.mxu1 %v1043_v23  ;;  %v1090_v9 = vld [vmem:[#allocation5 + $0x14c] ss:$16 sps:$4 sm:$0xff]   ;;  %v1088_v10 = vld [vmem:[#allocation5 + $0x148] ss:$16 sps:$4 sm:$0xff]  }
  0x41   :  { %610 = vmatprep.subr.bf16.mxu1 %v1044_v24  ;;  %v1096_v11 = vld [vmem:[#allocation5 + $0x12c] ss:$16 sps:$4 sm:$0xff]   ;;  %v1094_v12 = vld [vmem:[#allocation5 + $0x128] ss:$16 sps:$4 sm:$0xff]   ;;  %v1105_v24 = vld [vmem:[#allocation7 + $0x30] sm:$0xff]  }
  0x42   :  { %v1102_v13 = vld [vmem:[#allocation5 + $0x10c] ss:$16 sps:$4 sm:$0xff]   ;;  %v1100_v14 = vld [vmem:[#allocation5 + $0x108] ss:$16 sps:$4 sm:$0xff]  }
  0x43   :  { %960 = vmatpush3.bf16.msra.mxu0 %v1006_v18  ;;  %v1104_v23 = vld [vmem:[#allocation7 + $0x38] sm:$0xff]  }
  0x44   :  { %961 = vmatprep.subr.bf16.mxu0 %v1222_v1  ;;  %611 = vmatpush1.bf16.msra.mxu1 %v1049_v25  ;;  %v1106_v25 = vld [vmem:[#allocation7 + $0x28] sm:$0xff]  }
  0x45   :  { %612 = vmatprep.subr.bf16.mxu1 %v1050_v26  ;;  %v1107_v26 = vld [vmem:[#allocation7 + $0x20] sm:$0xff]  }
  0x47   :  { %962 = vmatpush3.bf16.msra.mxu0 %v1007_v21 }
  0x48   :  { %639 = vmatprep.subr.bf16.mxu0 %v1012_v22  ;;  %613 = vmatpush1.bf16.msra.mxu1 %v1055_v27  ;;  %v1108_v27 = vld [vmem:[#allocation7 + $0x18] sm:$0xff]  }
  0x49   :  { %614 = vmatprep.subr.bf16.mxu1 %v1056_v28  ;;  %v1109_v28 = vld [vmem:[#allocation7 + $0x10] sm:$0xff]  }
  0x4c   :  { %615 = vmatpush2.bf16.msra.mxu1 %v1061_v29  ;;  %v1110_v29 = vld [vmem:[#allocation7 + $0x8] sm:$0xff]  }
  0x4d   :  { %616 = vmatprep.subr.bf16.mxu1 %v1062_v30  ;;  %v1111_v30 = vld [vmem:[#allocation7] sm:$0xff]  }
  0x50   :  { %617 = vmatpush2.bf16.msra.mxu1 %v1067_v31  ;;  %v259_v31 = vshrl.u32 %v76_v43, 7 }
  0x51   :  { %618 = vmatprep.subr.bf16.mxu1 %v1068_v32 }
  0x52   :  { %v260_v32 = vsub.s32 0, %v259_v31 }
  0x54   :  { %619 = vmatpush2.bf16.msra.mxu1 %v1073_v33  ;;  %v256_v33 = vld [vmem:[%s1341_s5] sm:$0xf] }
  0x55   :  { %620 = vmatprep.subr.bf16.mxu1 %v1074_v34  ;;  %v264_v34 = vsub.s32 1, %v259_v31 }
  0x58   :  { %621 = vmatpush2.bf16.msra.mxu1 %v1079_v35  ;;  %v261_v35 = vrot.slane %v256_v33, %v260_v32 }
  0x59   :  { %622 = vmatprep.subr.bf16.mxu1 %v1080_v36  ;;  %v265_v36 = vrot.slane %v256_v33, %v264_v34 }
  0x5c   :  { %623 = vmatpush2.bf16.msra.mxu1 %v1085_v37 }
  0x5d   :  { %624 = vmatprep.subr.bf16.mxu1 %v1086_v38 }
  0x60   :  { %625 = vmatpush2.bf16.msra.mxu1 %v1091_v39 }
  0x61   :  { %626 = vmatprep.subr.bf16.mxu1 %v1092_v40 }
  0x64   :  { %627 = vmatpush2.bf16.msra.mxu1 %v1097_v41 }
  0x65   :  { %628 = vmatprep.subr.bf16.mxu1 %v1098_v42 }
  0x68   :  { %629 = vmatpush2.bf16.msra.mxu1 %v1103_v15 }
  0x69   :  { %967 = vmatprep.subr.bf16.mxu1 %v1222_v1 }
  0xa5   :  { %v80_v45 = vpop.permute.xlu0 %79 }
  0xa6   :  { %vm81_vm1 = vcmp.eq.s32.totalorder %v80_v45, %v77_v44  ;;  %v272_v45 = vsub.s32 3, %v259_v31 }
  0xa7   :  { %vm851_vm2 = vmpackc.low %vm81_vm1, %vm81_vm1 }
  0xa8   :  { %964 = vmatmul.mubr.msk.bf16.vlgmr.msra.gmra.mxu0 %vm851_vm2, %v1224_v48 }
  0xa9   :  { %640 = vmatpush1.bf16.msra.mxu0 %v1010_v46  ;;  %671 = vmatprep.mubr.bf16.mxu0 %v191_v17 }
  0xaa   :  { %641 = vmatprep.subr.bf16.mxu0 %v1018_v47 }
  0xad   :  { %642 = vmatpush1.bf16.msra.mxu0 %v1016_v49  ;;  %v273_v49 = vrot.slane %v256_v33, %v272_v45 }
  0xae   :  { %643 = vmatprep.subr.bf16.mxu0 %v1024_v50  ;;  %v268_v50 = vsub.s32 2, %v259_v31 }
  0xb1   :  { %644 = vmatpush1.bf16.msra.mxu0 %v1022_v51 }
  0xb2   :  { %645 = vmatprep.subr.bf16.mxu0 %v1030_v52  ;;  %v269_v52 = vrot.slane %v256_v33, %v268_v50 }
  0xb5   :  { %646 = vmatpush1.bf16.msra.mxu0 %v1028_v53 }
  0xb6   :  { %647 = vmatprep.subr.bf16.mxu0 %v1036_v54 }
  0xb9   :  { %648 = vmatpush1.bf16.msra.mxu0 %v1034_v55 }
  0xba   :  { %649 = vmatprep.subr.bf16.mxu0 %v1042_v56 }
  0xbd   :  { %650 = vmatpush1.bf16.msra.mxu0 %v1040_v57 }
  0xbe   :  { %651 = vmatprep.subr.bf16.mxu0 %v1048_v58 }
  0xc1   :  { %652 = vmatpush1.bf16.msra.mxu0 %v1046_v59 }
  0xc2   :  { %653 = vmatprep.subr.bf16.mxu0 %v1054_v60 }
  0xc5   :  { %654 = vmatpush1.bf16.msra.mxu0 %v1052_v61  ;;  %v189_v61 = vld [vmem:[%s1338_s2] sm:$0xff] }
  0xc6   :  { %655 = vmatprep.subr.bf16.mxu0 %v1060_v62 }
  0xc9   :  { %656 = vmatpush2.bf16.msra.mxu0 %v1058_v63 }
  0xca   :  { %657 = vmatprep.subr.bf16.mxu0 %v1066_v0 }
  0xcd   :  { %658 = vmatpush2.bf16.msra.mxu0 %v1064_v2 }
  0xce   :  { %659 = vmatprep.subr.bf16.mxu0 %v1072_v3 }
  0xd1   :  { %660 = vmatpush2.bf16.msra.mxu0 %v1070_v4 }
  0xd2   :  { %661 = vmatprep.subr.bf16.mxu0 %v1078_v5 }
  0xd5   :  { %662 = vmatpush2.bf16.msra.mxu0 %v1076_v6 }
  0xd6   :  { %663 = vmatprep.subr.bf16.mxu0 %v1084_v7 }
  0xd9   :  { %664 = vmatpush2.bf16.msra.mxu0 %v1082_v8 }
  0xda   :  { %665 = vmatprep.subr.bf16.mxu0 %v1090_v9  ;;  %v920_v9 = vld [vmem:[%s1343_s7] ss:$0 sm:$0xff] }
  0xdd   :  { %666 = vmatpush2.bf16.msra.mxu0 %v1088_v10 }
  0xde   :  { %667 = vmatprep.subr.bf16.mxu0 %v1096_v11 }
  0xe1   :  { %668 = vmatpush2.bf16.msra.mxu0 %v1094_v12 }
  0xe2   :  { %669 = vmatprep.subr.bf16.mxu0 %v1102_v13 }
  0xe5   :  { %670 = vmatpush2.bf16.msra.mxu0 %v1100_v14 }
 0x168   :  { %v182_v18 = vpop.f32.mrf.mxu0 }
 0x169   :  { %v190_v19 = vpack.c.bf16 %v182_v18, %v182_v18 }
 0x16a   :  { %v965_v20 = vpop.f32.mrf.mxu0 }
 0x16b   :  { %631 = vmatmul.mubr.bf16.vlgmr.msra.gmra.mxu1 %v190_v19  ;;  %672 = vmatmul.mubr.bf16.vlgmr.msra.gmra.mxu0 %v190_v19 }
 0x16c   :  { %v185_v21 = vpop.f32.mrf.mxu0  ;;  %983 = vmatprep.mubr.msk.bf16.mxu1 %vm1223_vm0, %v1222_v1  ;;  %968 = vmatpush3.bf16.msra.mxu1 %v1104_v23 }
 0x16d   :  { %969 = vmatprep.subr.bf16.mxu1 %v1222_v1 }
 0x16e   :  { %v966_v22 = vpop.f32.mrf.mxu0 }
 0x170   :  { %970 = vmatpush3.bf16.msra.mxu1 %v1105_v24 }
 0x171   :  { %971 = vmatprep.subr.bf16.mxu1 %v1222_v1 }
 0x174   :  { %972 = vmatpush3.bf16.msra.mxu1 %v1106_v25 }
 0x175   :  { %973 = vmatprep.subr.bf16.mxu1 %v1222_v1 }
 0x178   :  { %974 = vmatpush3.bf16.msra.mxu1 %v1107_v26 }
 0x179   :  { %975 = vmatprep.subr.bf16.mxu1 %v1222_v1 }
 0x17c   :  { %976 = vmatpush3.bf16.msra.mxu1 %v1108_v27 }
 0x17d   :  { %977 = vmatprep.subr.bf16.mxu1 %v1222_v1 }
 0x180   :  { %978 = vmatpush3.bf16.msra.mxu1 %v1109_v28 }
 0x181   :  { %979 = vmatprep.subr.bf16.mxu1 %v1222_v1 }
 0x184   :  { %980 = vmatpush3.bf16.msra.mxu1 %v1110_v29 }
 0x185   :  { %981 = vmatprep.subr.bf16.mxu1 %v1222_v1 }
 0x188   :  { %982 = vmatpush3.bf16.msra.mxu1 %v1111_v30 }
 0x22b   :  { %v632_v37 = vpop.f32.mrf.mxu1  ;;  %v673_v38 = vpop.f32.mrf.mxu0 }
 0x22c   :  { %v633_v39 = vadd.f32 %v632_v37, %v261_v35  ;;  %v674_v55 = vadd.f32 %v673_v38, %v269_v52 }
 0x22d   :  { %v634_v40 = vpop.f32.mrf.mxu1  ;;  %v675_v41 = vpop.f32.mrf.mxu0 }
 0x22e   :  { %v917_v42 = vmul.f32 -1.442695, %v633_v39  ;;  %v635_v44 = vadd.f32 %v634_v40, %v265_v36  ;;  %v676_v51 = vadd.f32 %v675_v41, %v273_v49 }
 0x22f   :  { %v636_v1 = vpop.f32.mrf.mxu1  ;;  %v677_v46 = vpop.f32.mrf.mxu0 }
 0x230   :  { %1112 = vpow2.f32 %v917_v42  ;;  %v918_v43 = vmul.f32 -1.442695, %v635_v44  ;;  %v919_v53 = vmul.f32 -1.442695, %v676_v51 }
 0x231   :  { %v637_v47 = vpop.f32.mrf.mxu1  ;;  %v678_v48 = vpop.f32.mrf.mxu0 }
 0x232   :  { %1114 = vpow2.f32 %v918_v43 }
 0x233   :  { %1116 = vpow2.f32 %v919_v53 }
 0x23d   :  { %v1113_v54 = vpop.eup %1112 }
 0x23e   :  { %v683_v56 = vadd.f32 1.0, %v1113_v54 }
 0x23f   :  { %v1115_v57 = vpop.eup %1114 }
 0x240   :  { %1118 = vrcp.f32 %v683_v56  ;;  %v689_v58 = vadd.f32 1.0, %v1115_v57  ;;  %v1117_v59 = vpop.eup %1116 }
 0x241   :  { %1120 = vtanh.f32 %v674_v55  ;;  %v696_v0 = vadd.f32 1.0, %v1117_v59 }
 0x242   :  { %1122 = vrcp.f32 %v689_v58 }
 0x243   :  { %1124 = vrcp.f32 %v696_v0 }
 0x24d   :  { %v1119_v60 = vpop.eup %1118 }
 0x24e   :  { %v1121_v62 = vpop.eup %1120 }
 0x24f   :  { %v1123_v63 = vpop.eup %1122  ;;  %v700_v2 = vmul.f32 %v1121_v62, %v1119_v60 }
 0x250   :  { %v699_v3 = vmul.f32 %v1123_v63, %v189_v61  ;;  %v1125_v5 = vpop.eup %1124 }
 0x252   :  { %v701_v4 = vadd.f32 %v700_v2, %v699_v3 }
 0x254   :  { %818 = vst [vmem:[%s1346_s10] sm:$0xff] %v701_v4  ;;  %1126 = vtanh.f32 %v701_v4  ;;  %s1188_s10 = scalar_lea.vmem %s826_s20, 128 }
 0x255   :  { %p1189_p1 = scmp.ne.s32.totalorder %s826_s20, %s1188_s10  ;;  %p1194_p3 = scmp.lt.s32.totalorder %s1188_s10, %s1188_s10 }
 0x257   :  { %p1195_p4 = por %p1194_p3, %p1193_p2 }
 0x259   :  { %p1196_p5 = pnand %p1195_p4, %p1189_p1 }
 0x261   :  { %v1127_v6 = vpop.eup %1126 }
 0x262   :  { %v703_v7 = vmul.f32 %v1127_v6, %v1125_v5 }
 0x264   :  { %v704_v8 = vpack.c.bf16 %v703_v7, %v703_v7  ;;  %817 = vst [vmem:[%s1345_s9] sm:$0xff] %v703_v7 }
 0x266   :  { %984 = vmatmul.mubr.bf16.vlgmr.msra.gmra.mxu1 %v704_v8 }
 0x326   :  { %v810_v10 = vpop.f32.mrf.mxu1 }
 0x327   :  { %v811_v11 = vadd.f32 %v920_v9, %v810_v10 }
 0x328   :  { %v985_v12 = vpop.f32.mrf.mxu1 }
 0x329   :  { %816 = vst [vmem:[#allocation8] sm:$0xff] %v811_v11 }
 0x32a   :  { %v813_v13 = vpop.f32.mrf.mxu1 }
 0x32b   :  { %1199 = shalt.err (!%p1196_p5)
}
 0x32c   :  { %828 = dma.vmem_to_hbm [thread:$0]  %s826_s20, 128, %s1344_s8, [#allocation4]   ;;  %v986_v14 = vpop.f32.mrf.mxu1 }
 0x32d   :  { %1212 = dma.done.wait [#allocation4], 128  }
 0x32e   :  { %1213 = vsyncadd [#allocation4], 4294967168 }
 0x32f   :  { %840 = vsyncpa [#allocation3], 1 }
 0x330   :  { %841 = vsyncpa [#allocation6], 1 }
 0x331   :  { %842 = vsyncpa [#allocation4], 1 }

</bundles_post_ra>
